<compile_context>
chip_gen: v7x
topology: tpu7x:2x2x1
jax: 0.10.0
libtpu: 0.0.40
codegen_flags: <defaults>
</compile_context>

<pallas_src>
import jax
import jax.numpy as jnp
from jax.experimental import pallas as pl
from jax.experimental.pallas import tpu as pltpu

LANE = 128
SUBLANE = 8


def _round_up(n, m):
    return (n + m - 1) // m * m


def _mlp_kernel(x_ref, w1_ref, b1_ref, w2_ref, b2_ref, o_ref):
    # fc1: [tb, F] @ [F, Hp]  (MXU, f32 accumulate).
    h = jnp.dot(x_ref[...], w1_ref[...], preferred_element_type=jnp.float32)
    # Bias-add + ReLU in f32 (safe on v5e's VPU; padded lanes stay exactly 0).
    h = jnp.maximum(h + b1_ref[...], 0.0)
    # fc2: [tb, Hp] @ [Hp, Op].  No dtype cast on h: it only added VPU pack
    # work (and v5e's VPU has no bf16); weights are tiny and read once.
    y = jnp.dot(h, w2_ref[...], preferred_element_type=jnp.float32)
    y = y + b2_ref[...]
    o_ref[...] = y.astype(o_ref.dtype)


def linear_model_forward(x, w1, b1, w2, b2, *, block_b=4096,
                         out_dtype=jnp.float32, x_buffers=2):
    """Forward pass of LinearModel: relu(x @ w1 + b1) @ w2 + b2.

    x: [B, F]; w1: [F, H]; b1: [H] or [1, H]; w2: [H, O]; b2: [O] or [1, O].
    Returns [B, O] in out_dtype (default float32).

    For repeated calls, wrap this whole function in jax.jit so the tiny
    weight pads and the final [:, :O] slice fuse with neighbors.
    """
    assert block_b % SUBLANE == 0, "block_b must be a multiple of 8"
    B, F = x.shape
    H = w1.shape[1]
    O = w2.shape[1]
    assert w2.shape[0] == H

    # Lane-pad hidden and output dims to 128 (dense vregs, unmasked stores).
    Hp = _round_up(H, LANE)
    Op = _round_up(O, LANE)

    b1 = b1.reshape(1, -1)
    b2 = b2.reshape(1, -1)
    w1p = jnp.pad(w1, ((0, 0), (0, Hp - H)))
    b1p = jnp.pad(b1, ((0, 0), (0, Hp - H))).astype(jnp.float32)
    w2p = jnp.pad(w2, ((0, Hp - H), (0, Op - O)))
    b2p = jnp.pad(b2, ((0, 0), (0, Op - O))).astype(jnp.float32)

    # Batch tile: multiple of 8 sublanes.  Guarantee >= 2 grid steps when the
    # batch is big enough so v7x's second TensorCore gets work; otherwise one
    # (possibly partial, store-masked) block.  No batch padding of x.
    if B > 2 * SUBLANE:
        tb = min(block_b, _round_up((B + 1) // 2, SUBLANE))
    else:
        tb = _round_up(max(B, 1), SUBLANE)
    tb = max(tb, SUBLANE)
    grid = (pl.cdiv(B, tb),)

    x_item = jnp.dtype(x.dtype).itemsize
    w_item = jnp.dtype(w1.dtype).itemsize
    out_item = jnp.dtype(out_dtype).itemsize

    # Explicit scoped-VMEM budget: x tiles + out tiles (double-buffered) +
    # weights/biases, with headroom.  v5e's 16 MiB default is too small for
    # block_b >= ~2048 f32; v7x physical VMEM is 64 MiB, so cap there.
    vmem_need = (max(x_buffers, 2) * tb * F * x_item
                 + 2 * tb * Op * out_item
                 + 2 * (F * Hp + Hp * Op) * w_item
                 + 2 * (Hp + Op) * 4)
    vmem_limit = min(max(int(vmem_need * 1.5) + (2 << 20), 32 << 20), 64 << 20)

    cost = pl.CostEstimate(
        flops=2 * B * (F * Hp + Hp * Op),
        transcendentals=0,
        bytes_accessed=(B * F * x_item
                        + (F * Hp + Hp * Op) * w_item
                        + (Hp + Op) * 4
                        + B * Op * out_item),
    )

    # Only pass pipeline_mode when the caller asks for non-default depth
    # (e.g. pl.Buffered(3) on v5e to hide exposed DMA latency).
    x_spec_kwargs = {}
    if x_buffers != 2:
        x_spec_kwargs["pipeline_mode"] = pl.Buffered(x_buffers)
    x_spec = pl.BlockSpec((tb, F), lambda i: (i, 0), **x_spec_kwargs)

    out = pl.pallas_call(
        _mlp_kernel,
        out_shape=jax.ShapeDtypeStruct((B, Op), out_dtype),
        grid=grid,
        in_specs=[
            x_spec,                                     # x: tiled over batch
            pl.BlockSpec((F, Hp), lambda i: (0, 0)),    # weights: VMEM-resident
            pl.BlockSpec((1, Hp), lambda i: (0, 0)),
            pl.BlockSpec((Hp, Op), lambda i: (0, 0)),
            pl.BlockSpec((1, Op), lambda i: (0, 0)),
        ],
        out_specs=pl.BlockSpec((tb, Op), lambda i: (i, 0)),
        compiler_params=pltpu.CompilerParams(
            dimension_semantics=("parallel",),
            vmem_limit_bytes=vmem_limit,
        ),
        cost_estimate=cost,
    )(x, w1p, b1p, w2p, b2p)

    # Drop the zero-padded output lanes.  Kept inside the (jitted) wrapper so
    # XLA can fuse the slice with whatever consumes the logits.
    return out[:, :O]


def init_linear_params(key, n_feature=192, h_dim=3 * 32, n_output=10):
    """PyTorch nn.Linear default init (uniform +-1/sqrt(fan_in)), (in, out) layout."""
    k1, k2, k3, k4 = jax.random.split(key, 4)
    bound1 = 1.0 / jnp.sqrt(n_feature)
    bound2 = 1.0 / jnp.sqrt(h_dim)
    w1 = jax.random.uniform(k1, (n_feature, h_dim), jnp.float32, -bound1, bound1)
    b1 = jax.random.uniform(k2, (1, h_dim), jnp.float32, -bound1, bound1)
    w2 = jax.random.uniform(k3, (h_dim, n_output), jnp.float32, -bound2, bound2)
    b2 = jax.random.uniform(k4, (1, n_output), jnp.float32, -bound2, bound2)
    return w1, b1, w2, b2


if __name__ == "__main__":
    key = jax.random.PRNGKey(0)
    kx, kp, kx2 = jax.random.split(key, 3)

    n_feature, h_dim, n_output = 192, 3 * 32, 10
    w1, b1, w2, b2 = init_linear_params(kp, n_feature, h_dim, n_output)

    def ref_fwd(x):
        return jnp.maximum(x @ w1 + b1, 0.0) @ w2 + b2

    fwd = jax.jit(linear_model_forward)

    # --- Small batch (inputs clamped to [0, 1] like the training script) ---
    batch = 8
    x = jnp.clip(
        jax.random.uniform(kx, (batch, n_feature), jnp.float32, -0.2, 1.2), 0.0, 1.0)
    out = jax.block_until_ready(fwd(x, w1, b1, w2, b2))
    assert out.shape == (batch, n_output)
    assert jnp.allclose(out, ref_fwd(x), atol=1e-4), "f32 mismatch vs reference"

    # --- Batch that is not a multiple of the tile: exercises the 2-step grid
    #     (v7x megacore path) and the masked partial last block, no batch pad.
    batch2 = 520
    x2 = jax.random.uniform(kx2, (batch2, n_feature), jnp.float32, 0.0, 1.0)
    out2 = jax.block_until_ready(fwd(x2, w1, b1, w2, b2))
    assert out2.shape == (batch2, n_output)
    assert jnp.allclose(out2, ref_fwd(x2), atol=1e-4), "grid/partial-block mismatch"

    print("KERNEL_OK")
</pallas_src>

<mosaic_0001>
module attributes {stable_mosaic.version = 11 : i64} {
  func.func @_mlp_kernel(%arg0: i32, %arg1: memref<8x192xf32, #tpu.memory_space<vmem>>, %arg2: memref<192x128xf32, #tpu.memory_space<vmem>>, %arg3: memref<1x128xf32, #tpu.memory_space<vmem>>, %arg4: memref<128x128xf32, #tpu.memory_space<vmem>>, %arg5: memref<1x128xf32, #tpu.memory_space<vmem>>, %arg6: memref<8x128xf32, #tpu.memory_space<vmem>>) attributes {dimension_semantics = [#tpu.dimension_semantics<parallel>], iteration_bounds = array<i64: 1>, scalar_prefetch = 0 : i64, scratch_operands = 0 : i64, tpu.core_type = #tpu.core_type<tc>, window_params = [{transform_indices = @transform_0, window_bounds = array<i64: 8, 192>}, {pipeline_mode = #tpu.pipeline_mode<synchronous>, transform_indices = @transform_1, window_bounds = array<i64: 192, 128>}, {pipeline_mode = #tpu.pipeline_mode<synchronous>, transform_indices = @transform_2, window_bounds = array<i64: 1, 128>}, {pipeline_mode = #tpu.pipeline_mode<synchronous>, transform_indices = @transform_3, window_bounds = array<i64: 128, 128>}, {pipeline_mode = #tpu.pipeline_mode<synchronous>, transform_indices = @transform_4, window_bounds = array<i64: 1, 128>}, {transform_indices = @transform_5, window_bounds = array<i64: 8, 128>}]} {
    %c0 = arith.constant 0 : index
    %c0_0 = arith.constant 0 : index
    %0 = vector.load %arg1[%c0, %c0_0] : memref<8x192xf32, #tpu.memory_space<vmem>>, vector<8x192xf32>
    %c0_1 = arith.constant 0 : index
    %c0_2 = arith.constant 0 : index
    %1 = vector.load %arg2[%c0_1, %c0_2] : memref<192x128xf32, #tpu.memory_space<vmem>>, vector<192x128xf32>
    %cst = arith.constant dense<0.000000e+00> : vector<8x128xf32>
    %2 = tpu.matmul %0, %1, %cst {dimension_numbers = #tpu.dot_dimension_numbers<[1], [0], [0], [1], [0, 0, 1, 1], [], []>} : vector<8x192xf32>, vector<192x128xf32>, vector<8x128xf32> -> vector<8x128xf32>
    %c0_3 = arith.constant 0 : index
    %c0_4 = arith.constant 0 : index
    %3 = vector.load %arg3[%c0_3, %c0_4] : memref<1x128xf32, #tpu.memory_space<vmem>>, vector<1x128xf32>
    %4 = vector.broadcast %3 : vector<1x128xf32> to vector<8x128xf32>
    %5 = arith.addf %2, %4 : vector<8x128xf32>
    %cst_5 = arith.constant 0.000000e+00 : f32
    %6 = vector.broadcast %cst_5 : f32 to vector<8x128xf32>
    %7 = arith.maximumf %5, %6 : vector<8x128xf32>
    %c0_6 = arith.constant 0 : index
    %c0_7 = arith.constant 0 : index
    %8 = vector.load %arg4[%c0_6, %c0_7] : memref<128x128xf32, #tpu.memory_space<vmem>>, vector<128x128xf32>
    %cst_8 = arith.constant dense<0.000000e+00> : vector<8x128xf32>
    %9 = tpu.matmul %7, %8, %cst_8 {dimension_numbers = #tpu.dot_dimension_numbers<[1], [0], [0], [1], [0, 0, 1, 1], [], []>} : vector<8x128xf32>, vector<128x128xf32>, vector<8x128xf32> -> vector<8x128xf32>
    %c0_9 = arith.constant 0 : index
    %c0_10 = arith.constant 0 : index
    %10 = vector.load %arg5[%c0_9, %c0_10] : memref<1x128xf32, #tpu.memory_space<vmem>>, vector<1x128xf32>
    %11 = vector.broadcast %10 : vector<1x128xf32> to vector<8x128xf32>
    %12 = arith.addf %9, %11 : vector<8x128xf32>
    %c0_11 = arith.constant 0 : index
    %c0_12 = arith.constant 0 : index
    %13 = vector.load %arg6[%c0_11, %c0_12] : memref<8x128xf32, #tpu.memory_space<vmem>>, vector<8x128xf32>
    tpu.vector_store %arg6[%c0_11, %c0_12], %12 {strides = array<i32>} : memref<8x128xf32, #tpu.memory_space<vmem>>, vector<8x128xf32>,
    return
  }
  func.func @transform_0(%arg0: i32) -> (i32, i32) {
    %c0_i32 = arith.constant 0 : i32
    %c0_i32_0 = arith.constant 0 : i32
    return %arg0, %c0_i32 : i32, i32
  }
  func.func @transform_1(%arg0: i32) -> (i32, i32) {
    %c0_i32 = arith.constant 0 : i32
    %c0_i32_0 = arith.constant 0 : i32
    %c0_i32_1 = arith.constant 0 : i32
    return %c0_i32, %c0_i32_0 : i32, i32
  }
  func.func @transform_2(%arg0: i32) -> (i32, i32) {
    %c0_i32 = arith.constant 0 : i32
    %c0_i32_0 = arith.constant 0 : i32
    %c0_i32_1 = arith.constant 0 : i32
    return %c0_i32, %c0_i32_0 : i32, i32
  }
  func.func @transform_3(%arg0: i32) -> (i32, i32) {
    %c0_i32 = arith.constant 0 : i32
    %c0_i32_0 = arith.constant 0 : i32
    %c0_i32_1 = arith.constant 0 : i32
    return %c0_i32, %c0_i32_0 : i32, i32
  }
  func.func @transform_4(%arg0: i32) -> (i32, i32) {
    %c0_i32 = arith.constant 0 : i32
    %c0_i32_0 = arith.constant 0 : i32
    %c0_i32_1 = arith.constant 0 : i32
    return %c0_i32, %c0_i32_0 : i32, i32
  }
  func.func @transform_5(%arg0: i32) -> (i32, i32) {
    %c0_i32 = arith.constant 0 : i32
    %c0_i32_0 = arith.constant 0 : i32
    return %arg0, %c0_i32 : i32, i32
  }
}

</mosaic_0001>

<bundles_post_ra>
// kernel: linear_model_forward.1
= control target key start
LH: loop header
LB: loop body
LE: loop exit
PB: predicated region body
PF: predicated region fallthrough
CT: control target
= control target key end

     0   :  { %v380_v3 = vmov 0.0|0.0   ;;  %vm54_vm0 = vcmask 523264   ;;  %s578_s0 = inlined_call_operand.vmem [shape: f32[8,192], index: 0, kind: input, shape index: {}]   ;;  %s579_s1 = inlined_call_operand.vmem [shape: f32[192,128], index: 1, kind: input, shape index: {}]   ;;  %s580_s2 = inlined_call_operand.vmem [shape: f32[1,128], index: 2, kind: input, shape index: {}]   ;;  %s581_s3 = inlined_call_operand.vmem [shape: f32[128,128], index: 3, kind: input, shape index: {}]   ;;  %s582_s4 = inlined_call_operand.vmem [shape: f32[1,128], index: 4, kind: input, shape index: {}]   ;;  %s583_s5 = inlined_call_operand.hbm [shape: f32[8,128], index: 5, kind: output, shape index: {}]  }
   0x1   :  { %v23_v0 = vld [vmem:[%s579_s1] sm:$0xff]  ;;  %v24_v1 = vld [vmem:[%s579_s1 + $0x8] sm:$0xff]  ;;  %v25_v2 = vld [vmem:[%s579_s1 + $0x10] sm:$0xff]  ;;  %292 = vmatprep.subr.bf16.mxu0 %v380_v3  ;;  %328 = vmatprep.subr.bf16.mxu1 %v380_v3 }
   0x2   :  { %v293_v4 = vpack.c.bf16 %v24_v1, %v23_v0  ;;  %v26_v5 = vld [vmem:[%s579_s1 + $0x18] sm:$0xff]  ;;  %v27_v7 = vld [vmem:[%s579_s1 + $0x20] sm:$0xff]  ;;  %v28_v8 = vld [vmem:[%s579_s1 + $0x28] sm:$0xff] }
   0x3   :  { %v296_v6 = vpack.c.bf16 %v26_v5, %v25_v2  ;;  %v299_v9 = vpack.c.bf16 %v28_v8, %v27_v7  ;;  %v29_v10 = vld [vmem:[%s579_s1 + $0x30] sm:$0xff]  ;;  %v30_v11 = vld [vmem:[%s579_s1 + $0x38] sm:$0xff]  ;;  %v22_v12 = vld [vmem:[%s578_s0 + $0x8] sm:$0xff] }
   0x4   :  { %294 = vmatpush1.bf16.msra.mxu0 %v293_v4  ;;  %v129_v13 = vld [vmem:[%s581_s3] sm:$0xff]  ;;  %238 = vmatprep.mubr.msk.f32.mxu0 %vm54_vm0, %v22_v12  ;;  %v130_v14 = vld [vmem:[%s581_s3 + $0x8] sm:$0xff]  ;;  %v131_v15 = vld [vmem:[%s581_s3 + $0x10] sm:$0xff]  ;;  %v302_v18 = vpack.c.bf16 %v30_v11, %v29_v10 }
   0x5   :  { %295 = vmatprep.subr.bf16.mxu0 %v380_v3  ;;  %v132_v16 = vld [vmem:[%s581_s3 + $0x18] sm:$0xff]  ;;  %v329_v17 = vpack.c.bf16 %v130_v14, %v129_v13  ;;  %v31_v19 = vld [vmem:[%s579_s1 + $0x40] sm:$0xff]  ;;  %v32_v20 = vld [vmem:[%s579_s1 + $0x48] sm:$0xff] }
   0x6   :  { %v332_v21 = vpack.c.bf16 %v132_v16, %v131_v15  ;;  %v133_v22 = vld [vmem:[%s581_s3 + $0x20] sm:$0xff]  ;;  %v134_v23 = vld [vmem:[%s581_s3 + $0x28] sm:$0xff] }
   0x7   :  { %330 = vmatpush3.bf16.msra.mxu1 %v329_v17 }
   0x8   :  { %297 = vmatpush1.bf16.msra.mxu0 %v296_v6  ;;  %331 = vmatprep.subr.bf16.mxu1 %v380_v3 }
   0x9   :  { %298 = vmatprep.subr.bf16.mxu0 %v380_v3 }
   0xc   :  { %300 = vmatpush1.bf16.msra.mxu0 %v299_v9 }
   0xd   :  { %301 = vmatprep.subr.bf16.mxu0 %v380_v3 }
   0xe   :  { %10 = vsyncpa [#allocation3], 0  ;;  %v305_v24 = vpack.c.bf16 %v32_v20, %v31_v19  ;;  %v33_v25 = vld [vmem:[%s579_s1 + $0x50] sm:$0xff]  ;;  %v34_v26 = vld [vmem:[%s579_s1 + $0x58] sm:$0xff]  ;;  %333 = vmatpush3.bf16.msra.mxu1 %v332_v21  ;;  %v335_v27 = vpack.c.bf16 %v134_v23, %v133_v22  ;;  %vm381_vm1 = vmmov 0   ;;  %v382_v63 = vmov 0.0  }
   0xf   :  { %334 = vmatprep.subr.bf16.mxu1 %v380_v3  ;;  %v135_v28 = vld [vmem:[%s581_s3 + $0x30] sm:$0xff]  ;;  %v136_v29 = vld [vmem:[%s581_s3 + $0x38] sm:$0xff]  ;;  %v308_v30 = vpack.c.bf16 %v34_v26, %v33_v25  ;;  %v35_v31 = vld [vmem:[%s579_s1 + $0x60] sm:$0xff]  ;;  %289 = vmatprep.mubr.msk.f32.mxu1 %vm381_vm1, %v382_v63  ;;  %s383_s29 = smov [#allocation2]  }
  0x10   :  { %303 = vmatpush1.bf16.msra.mxu0 %v302_v18  ;;  %v36_v32 = vld [vmem:[%s579_s1 + $0x68] sm:$0xff]  ;;  %v338_v33 = vpack.c.bf16 %v136_v29, %v135_v28  ;;  %v137_v34 = vld [vmem:[%s581_s3 + $0x40] sm:$0xff]  ;;  %v37_v37 = vld [vmem:[%s579_s1 + $0x70] sm:$0xff] }
  0x11   :  { %304 = vmatprep.subr.bf16.mxu0 %v380_v3  ;;  %v138_v35 = vld [vmem:[%s581_s3 + $0x48] sm:$0xff]  ;;  %v311_v36 = vpack.c.bf16 %v36_v32, %v35_v31  ;;  %v38_v38 = vld [vmem:[%s579_s1 + $0x78] sm:$0xff]  ;;  %v139_v40 = vld [vmem:[%s581_s3 + $0x50] sm:$0xff] }
  0x12   :  { %336 = vmatpush3.bf16.msra.mxu1 %v335_v27  ;;  %v341_v39 = vpack.c.bf16 %v138_v35, %v137_v34  ;;  %v140_v41 = vld [vmem:[%s581_s3 + $0x58] sm:$0xff]  ;;  %v314_v42 = vpack.c.bf16 %v38_v38, %v37_v37  ;;  %v39_v43 = vld [vmem:[%s579_s1 + $0x80] sm:$0xff]  ;;  %v40_v44 = vld [vmem:[%s579_s1 + $0x88] sm:$0xff] }
  0x13   :  { %337 = vmatprep.subr.bf16.mxu1 %v380_v3  ;;  %v344_v45 = vpack.c.bf16 %v140_v41, %v139_v40  ;;  %v141_v46 = vld [vmem:[%s581_s3 + $0x60] sm:$0xff]  ;;  %v142_v47 = vld [vmem:[%s581_s3 + $0x68] sm:$0xff]  ;;  %v317_v48 = vpack.c.bf16 %v40_v44, %v39_v43  ;;  %v41_v49 = vld [vmem:[%s579_s1 + $0x90] sm:$0xff] }
  0x14   :  { %306 = vmatpush1.bf16.msra.mxu0 %v305_v24  ;;  %v42_v50 = vld [vmem:[%s579_s1 + $0x98] sm:$0xff]  ;;  %v347_v51 = vpack.c.bf16 %v142_v47, %v141_v46  ;;  %v43_v53 = vld [vmem:[%s579_s1 + $0xa0] sm:$0xff]  ;;  %v44_v54 = vld [vmem:[%s579_s1 + $0xa8] sm:$0xff] }
  0x15   :  { %307 = vmatprep.subr.bf16.mxu0 %v380_v3  ;;  %v320_v52 = vpack.c.bf16 %v42_v50, %v41_v49  ;;  %v323_v55 = vpack.c.bf16 %v44_v54, %v43_v53  ;;  %v45_v56 = vld [vmem:[%s579_s1 + $0xb0] sm:$0xff]  ;;  %v46_v57 = vld [vmem:[%s579_s1 + $0xb8] sm:$0xff]  ;;  %v21_v59 = vld [vmem:[%s578_s0] sm:$0xff] }
  0x16   :  { %339 = vmatpush3.bf16.msra.mxu1 %v338_v33  ;;  %v326_v58 = vpack.c.bf16 %v46_v57, %v45_v56  ;;  %v143_v60 = vld [vmem:[%s581_s3 + $0x70] sm:$0xff]  ;;  %v144_v61 = vld [vmem:[%s581_s3 + $0x78] sm:$0xff]  ;;  %v237_v0 = vld [vmem:[%s580_s2] ss:$0 sm:$0xff]  ;;  %s229_s3 = sshll.u32 %s383_s29, 4  ;;  %s230_s3 = int_to_ptr.vmem [resolvable:$true] %s229_s3 }
  0x17   :  { %340 = vmatprep.subr.bf16.mxu1 %v380_v3  ;;  %v350_v62 = vpack.c.bf16 %v144_v61, %v143_v60  ;;  %v239_v5 = vld [vmem:[%s582_s4] ss:$0 sm:$0xff]  ;;  %s356_s30 = scalar_lea.vmem %s230_s3, 128  ;;  %p361_p1 = scmp.lt.s32.totalorder %s230_s3, %s230_s3 }
  0x18   :  { %309 = vmatpush1.bf16.msra.mxu0 %v308_v30  ;;  %p357_p0 = scmp.ne.s32.totalorder %s230_s3, %s356_s30  ;;  %p362_p2 = scmp.lt.s32.totalorder %s356_s30, %s356_s30 }
  0x19   :  { %310 = vmatprep.subr.bf16.mxu0 %v380_v3 }
  0x1a   :  { %342 = vmatpush3.bf16.msra.mxu1 %v341_v39  ;;  %p363_p3 = por %p362_p2, %p361_p1 }
  0x1b   :  { %343 = vmatprep.subr.bf16.mxu1 %v380_v3 }
  0x1c   :  { %312 = vmatpush1.bf16.msra.mxu0 %v311_v36  ;;  %p364_p4 = pnand %p363_p3, %p357_p0 }
  0x1d   :  { %313 = vmatprep.subr.bf16.mxu0 %v380_v3 }
  0x1e   :  { %345 = vmatpush3.bf16.msra.mxu1 %v344_v45 }
  0x1f   :  { %346 = vmatprep.subr.bf16.mxu1 %v380_v3 }
  0x20   :  { %315 = vmatpush1.bf16.msra.mxu0 %v314_v42 }
  0x21   :  { %316 = vmatprep.subr.bf16.mxu0 %v380_v3 }
  0x22   :  { %348 = vmatpush3.bf16.msra.mxu1 %v347_v51 }
  0x23   :  { %349 = vmatprep.subr.bf16.mxu1 %v380_v3 }
  0x24   :  { %318 = vmatpush1.bf16.msra.mxu0 %v317_v48 }
  0x25   :  { %319 = vmatprep.subr.bf16.mxu0 %v380_v3 }
  0x26   :  { %351 = vmatpush3.bf16.msra.mxu1 %v350_v62 }
  0x28   :  { %321 = vmatpush1.bf16.msra.mxu0 %v320_v52 }
  0x29   :  { %322 = vmatprep.subr.bf16.mxu0 %v380_v3 }
  0x2c   :  { %324 = vmatpush1.bf16.msra.mxu0 %v323_v55 }
  0x2d   :  { %325 = vmatprep.subr.bf16.mxu0 %v380_v3 }
  0x30   :  { %327 = vmatpush1.bf16.msra.mxu0 %v326_v58 }
  0x33   :  { %123 = vmatmul.mubr.f32.vlgmr.msra.gmra.mrb[0].mxu0 %v21_v59 }
 0x106   :  { %v124_v1 = vpop.f32.mrb[0].mxu0 }
 0x107   :  { %v125_v2 = vadd.f32 %v237_v0, %v124_v1  ;;  %v126_v3 = vpop.f32.mrb[1].mxu0 }
 0x109   :  { %v128_v4 = vmax.f32 %v125_v2, 0.0 }
 0x10b   :  { %290 = vmatmul.mubr.f32.vlgmr.msra.gmra.mrb[0].mxu1 %v128_v4 }
 0x1de   :  { %v218_v6 = vpop.f32.mrb[0].mxu1 }
 0x1df   :  { %v219_v7 = vadd.f32 %v239_v5, %v218_v6  ;;  %v291_v8 = vpop.f32.mrb[1].mxu1 }
 0x1e1   :  { %222 = vst [vmem:[#allocation2] sm:$0xff] %v219_v7 }
 0x1e2   :  { %367 = shalt.err (!%p364_p4)
}
 0x1e3   :  { %s368_s7 = scalar_lea.hbm %s583_s5, 128 }
 0x1e4   :  { %p369_p5 = scmp.ne.s32.totalorder %s583_s5, %s368_s7  ;;  %p372_p6 = scmp.lt.u32.totalorder %s368_s7, %s583_s5 }
 0x1e6   :  { %p374_p7 = pnand %p372_p6, %p369_p5 }
 0x1e8   :  { %377 = shalt.err (!%p374_p7)
}
 0x1e9   :  { %232 = dma.vmem_to_hbm [thread:$0]  %s230_s3, 128, %s583_s5, [#allocation3]  }
 0x1ea   :  { %378 = dma.done.wait [#allocation3], 128  }
 0x1eb   :  { %379 = vsyncadd [#allocation3], 4294967168 }
 0x1ec   :  { %236 = vsyncpa [#allocation3], 1 }

</bundles_post_ra>
